<compile_context>
chip_gen: v5e
topology: v5e:2x2
jax: 0.10.0
libtpu: 0.0.40
codegen_flags: <defaults>
</compile_context>

<pallas_src>
import functools

import numpy as np
import jax
import jax.numpy as jnp
from jax import lax
from jax.experimental import pallas as pl
from jax.experimental.pallas import tpu as pltpu

POOL_SIZES = (1, 2, 4, 8)
BN_EPS = 1e-5
_HI = lax.Precision.HIGHEST  # used only by the pure-JAX reference


# ---------------------------------------------------------------------------
# Constant matrices (shape-only; built once per (H, W) and cached).
# ---------------------------------------------------------------------------
def _adaptive_pool_matrix(H, W, k):
    """(k*k, H*W) matrix implementing nn.AdaptiveAvgPool2d(k) on an HxW map."""
    def bins(n):
        starts = [int(np.floor(i * n / k)) for i in range(k)]
        ends = [int(np.ceil((i + 1) * n / k)) for i in range(k)]
        return starts, ends

    hs, he = bins(H)
    ws, we = bins(W)
    P = np.zeros((k * k, H * W), dtype=np.float32)
    for jh in range(k):
        for jw in range(k):
            cnt = (he[jh] - hs[jh]) * (we[jw] - ws[jw])
            for h in range(hs[jh], he[jh]):
                for w in range(ws[jw], we[jw]):
                    P[jh * k + jw, h * W + w] = 1.0 / cnt
    return P


def _bilinear_upsample_matrix(out_n, in_n):
    """(out_n, in_n) 1-D bilinear interpolation matrix, align_corners=True."""
    U = np.zeros((out_n, in_n), dtype=np.float32)
    if in_n == 1:
        U[:, 0] = 1.0
        return U
    for i in range(out_n):
        t = i * (in_n - 1) / (out_n - 1)
        lo = min(int(np.floor(t)), in_n - 2)
        f = t - lo
        U[i, lo] += 1.0 - f
        U[i, lo + 1] += f
    return U


def _upsample_matrix_2d(H, W, k):
    Uh = _bilinear_upsample_matrix(H, k)
    Uw = _bilinear_upsample_matrix(W, k)
    return np.einsum("ha,wb->hwab", Uh, Uw).reshape(H * W, k * k).astype(np.float32)


@functools.lru_cache(maxsize=None)
def _stacked_spatial_constants(H, W):
    """Stacked pooling / upsampling operators + per-level lane masks (cached)."""
    HW = H * W
    total = sum(k * k for k in POOL_SIZES)                 # 85
    kp = ((total + 127) // 128) * 128                      # lane-dense pad -> 128
    k_all_t = np.zeros((HW, kp), np.float32)
    g_all_t = np.zeros((kp, HW), np.float32)
    masks = np.zeros((len(POOL_SIZES), 1, kp), np.float32)
    off = 0
    for i, k in enumerate(POOL_SIZES):
        k_all_t[:, off:off + k * k] = _adaptive_pool_matrix(H, W, k).T
        g_all_t[off:off + k * k, :] = _upsample_matrix_2d(H, W, k).T
        masks[i, 0, off:off + k * k] = 1.0
        off += k * k
    return (jnp.asarray(k_all_t, jnp.bfloat16),
            jnp.asarray(g_all_t, jnp.bfloat16),
            jnp.asarray(masks, jnp.float32),
            kp)


# ---------------------------------------------------------------------------
# Pallas kernel: one grid step per block of Nb batch elements.
# ---------------------------------------------------------------------------
def _spp_kernel(x_ref, kall_ref, gall_ref, wc_ref, wfx_ref, mask_ref, bias_ref,
                o_ref):
    nb, cp, hw = x_ref.shape
    kp = kall_ref.shape[1]
    nlev = mask_ref.shape[0]

    # Load f32; merge (Nb, C) onto the sublane/M axis (free: cp % 8 == 0);
    # cast to bf16 in-register for the MXU.
    x3 = x_ref[...]                                                # (nb, cp, hw) f32
    x2 = x3.reshape(nb * cp, hw).astype(jnp.bfloat16)              # (nb*cp, hw)

    # (1) All four adaptive average pools for the whole batch block: 1 matmul.
    pooled = jnp.dot(x2, kall_ref[...],
                     preferred_element_type=jnp.float32)           # (nb*cp, kp)
    pooled_b = pooled.reshape(nb, cp, kp).astype(jnp.bfloat16)     # (nb, cp, kp)

    # (2) Folded branch+fusion (+BN scale) channel mix: all 4 pyramid levels in
    #     one batched matmul, then per-level lane mask + level-sum.
    wc_b = jnp.broadcast_to(wc_ref[...], (nb, nlev * cp, cp))
    z4 = jnp.einsum("bmc,bcp->bmp", wc_b, pooled_b,
                    preferred_element_type=jnp.float32)            # (nb, 4*cp, kp)
    z = jnp.sum(z4.reshape(nb, nlev, cp, kp) * mask_ref[...], axis=1)  # (nb, cp, kp)

    # (3) Bilinear upsample of all levels + sum: one matmul with M = nb*cp.
    up = jnp.dot(z.reshape(nb * cp, kp).astype(jnp.bfloat16), gall_ref[...],
                 preferred_element_type=jnp.float32)               # (nb*cp, hw)

    # (4) Direct path of the fusion conv (BN scale already folded into wfx).
    wfx_b = jnp.broadcast_to(wfx_ref[...], (nb, cp, cp))
    acc = jnp.einsum("boc,bcs->bos", wfx_b, x3.astype(jnp.bfloat16),
                     preferred_element_type=jnp.float32)           # (nb, cp, hw)

    out = acc + up.reshape(nb, cp, hw) + bias_ref[...]
    o_ref[...] = jnp.maximum(out, 0.0).astype(o_ref.dtype)
    # TODO(synk): for very large H*W, chunk steps (3)/(4) and the store over
    # lane tiles of HW to bound the f32 accumulator footprint.


# ---------------------------------------------------------------------------
# Wrapper
# ---------------------------------------------------------------------------
def _pick_batch_block(n, cp):
    """Largest divisor of n with nb*cp <= ~256 MXU rows; when n is large enough,
    keep >= 2 grid steps so both v7x TensorCores get work."""
    target = max(1, 256 // max(cp, 1))
    divs = [d for d in range(1, n + 1) if n % d == 0 and d <= target]
    nb = max(divs) if divs else 1
    if n >= 4 and n // nb < 2:
        two_step = [d for d in divs if n // d >= 2]
        if two_step:
            nb = max(two_step)
    return nb


def enhanced_spp_forward(x_nchw, params, *, out_dtype=jnp.float32):
    # out_dtype=jnp.bfloat16 halves output HBM writeback if the consumer
    # tolerates it; default f32 preserves the module's output dtype.
    N, C, H, W = x_nchw.shape
    assert C % 4 == 0, "EnhancedSPP requires in_channels divisible by 4"
    HW = H * W
    cp = ((C + 7) // 8) * 8            # pad channels to the f32 sublane multiple
    n_lev = len(POOL_SIZES)

    k_all_t, g_all_t, masks, kp = _stacked_spatial_constants(H, W)

    # Fold (inference-mode) BatchNorm into a per-output-channel scale (pushed
    # into the channel-mixing weights) and a bias.
    # TODO(synk): PyTorch default training-mode BN (batch statistics) is not
    # reproduced; this implements eval-mode BN with the given running stats.
    inv_std = 1.0 / jnp.sqrt(params["bn_var"] + BN_EPS)
    scale = params["bn_gamma"] * inv_std                           # (C,)
    bias = params["bn_beta"] - params["bn_mean"] * scale           # (C,)

    # TODO(synk): the PyTorch module declares fusion_conv as Conv2d(C, C, 1) but
    # feeds it the 2C-channel concat (which would raise at runtime); we use the
    # intended (C, 2C) 1x1 fusion weight.
    wf = params["w_fusion"]                                        # (C, 2C)
    c4 = C // 4
    pad2 = ((0, cp - C), (0, cp - C))
    wfx = jnp.pad(scale[:, None] * wf[:, :C], pad2).astype(jnp.bfloat16)   # (cp, cp)
    wcomb = jnp.concatenate(
        [jnp.pad(scale[:, None]
                 * jnp.dot(wf[:, C + i * c4: C + (i + 1) * c4],
                           params["w_branch"][i]), pad2)
         for i in range(n_lev)], axis=0).astype(jnp.bfloat16)              # (4*cp, cp)
    bias_col = jnp.pad(bias, (0, cp - C)).reshape(cp, 1).astype(jnp.float32)

    # x stays f32 (no wrapper-side bf16 cast pass); free reshape, channels
    # zero-padded to the sublane multiple.
    x_flat = x_nchw.reshape(N, C, HW).astype(jnp.float32)
    if cp != C:
        x_flat = jnp.pad(x_flat, ((0, 0), (0, cp - C), (0, 0)))

    nb = _pick_batch_block(N, cp)
    grid = (N // nb,)

    out_esize = jnp.dtype(out_dtype).itemsize
    const_bytes = ((k_all_t.size + g_all_t.size + wcomb.size + wfx.size) * 2
                   + (masks.size + bias_col.size) * 4)
    block_bytes = nb * cp * HW * (4 + out_esize)
    # Scoped VMEM sized to the double-buffered working set; capped at 64 MiB so
    # it stays inside v7x's physical VMEM (v5e/v6e could go higher for big HW).
    vmem_limit = int(min(64 * 1024 * 1024,
                         max(32 * 1024 * 1024,
                             2 * (block_bytes + const_bytes) + (1 << 20))))

    flops = 2 * N * cp * (HW * kp + kp * HW + cp * HW + n_lev * cp * kp)
    bytes_accessed = int(x_flat.size * 4 + N * cp * HW * out_esize + const_bytes)

    # TODO(synk): the grid-invariant constants (K_all^T/G_all^T/Wcomb/Wfx/masks/
    # bias) could be single-buffered via pipeline_mode=pl.Buffered(1) to halve
    # their VMEM footprint on v7x; skipped to keep compilation maximally portable.
    out = pl.pallas_call(
        _spp_kernel,
        out_shape=jax.ShapeDtypeStruct((N, cp, HW), out_dtype),
        grid_spec=pltpu.PrefetchScalarGridSpec(
            num_scalar_prefetch=0,
            grid=grid,
            in_specs=[
                pl.BlockSpec((nb, cp, HW), lambda n: (n, 0, 0)),      # x block
                pl.BlockSpec((HW, kp), lambda n: (0, 0)),             # K_all^T
                pl.BlockSpec((kp, HW), lambda n: (0, 0)),             # G_all^T
                pl.BlockSpec((n_lev * cp, cp), lambda n: (0, 0)),     # Wcomb stack
                pl.BlockSpec((cp, cp), lambda n: (0, 0)),             # Wfx
                pl.BlockSpec((n_lev, 1, kp), lambda n: (0, 0, 0)),    # lane masks
                pl.BlockSpec((cp, 1), lambda n: (0, 0)),              # BN bias
            ],
            out_specs=pl.BlockSpec((nb, cp, HW), lambda n: (n, 0, 0)),
        ),
        compiler_params=pltpu.CompilerParams(
            dimension_semantics=("parallel",),
            vmem_limit_bytes=vmem_limit,
        ),
        cost_estimate=pl.CostEstimate(flops=flops, transcendentals=0,
                                      bytes_accessed=bytes_accessed),
    )(x_flat, k_all_t, g_all_t, wcomb, wfx, masks, bias_col)

    if cp != C:
        out = out[:, :C, :]
    return out.reshape(N, C, H, W)      # free reshape, stays NCHW


# ---------------------------------------------------------------------------
# Pure-JAX f32 reference (mirrors the PyTorch forward) for correctness check.
# NOTE: its pooling uses a reshape-mean, exact here because H, W are divisible
# by every pool size; the kernel implements true adaptive pooling.
# ---------------------------------------------------------------------------
def reference_forward(x, params):
    N, C, H, W = x.shape
    outs = [x]
    for i, k in enumerate(POOL_SIZES):
        sh, sw = H // k, W // k
        pooled = x.reshape(N, C, k, sh, k, sw).mean(axis=(3, 5))      # adaptive avg pool
        conv = jnp.einsum("oc,nchw->nohw", params["w_branch"][i], pooled,
                          precision=_HI)
        Uh = jnp.asarray(_bilinear_upsample_matrix(H, k))
        Uw = jnp.asarray(_bilinear_upsample_matrix(W, k))
        up = jnp.einsum("ha,wb,ncab->nchw", Uh, Uw, conv, precision=_HI)
        outs.append(up)
    cat = jnp.concatenate(outs, axis=1)                               # (N, 2C, H, W)
    f = jnp.einsum("oc,nchw->nohw", params["w_fusion"], cat, precision=_HI)
    g = params["bn_gamma"][None, :, None, None]
    b = params["bn_beta"][None, :, None, None]
    m = params["bn_mean"][None, :, None, None]
    v = params["bn_var"][None, :, None, None]
    bn = (f - m) / jnp.sqrt(v + BN_EPS) * g + b
    return jnp.maximum(bn, 0.0)


if __name__ == "__main__":
    key = jax.random.PRNGKey(0)
    N, C, H, W = 2, 8, 16, 16
    ks = jax.random.split(key, 8)
    x = jax.random.normal(ks[0], (N, C, H, W), jnp.float32)

    params = {
        "w_branch": [0.1 * jax.random.normal(ks[1 + i], (C // 4, C), jnp.float32)
                     for i in range(4)],
        "w_fusion": 0.1 * jax.random.normal(ks[5], (C, 2 * C), jnp.float32),
        "bn_gamma": 1.0 + 0.1 * jax.random.normal(ks[6], (C,), jnp.float32),
        "bn_beta": 0.1 * jax.random.normal(ks[7], (C,), jnp.float32),
        "bn_mean": jnp.zeros((C,), jnp.float32),
        "bn_var": jnp.ones((C,), jnp.float32),
    }

    out = enhanced_spp_forward(x, params)
    jax.block_until_ready(out)

    ref = reference_forward(x, params)
    # Kernel feeds the MXU bf16 operands (f32 accumulation); reference is f32.
    np.testing.assert_allclose(np.asarray(out), np.asarray(ref), rtol=2e-2, atol=2e-2)
    print("KERNEL_OK")
</pallas_src>

<mosaic_0001>
module attributes {stable_mosaic.version = 11 : i64} {
  func.func @_spp_kernel(%arg0: i32, %arg1: memref<2x8x256xf32, #tpu.memory_space<vmem>>, %arg2: memref<256x128xbf16, #tpu.memory_space<vmem>>, %arg3: memref<128x256xbf16, #tpu.memory_space<vmem>>, %arg4: memref<32x8xbf16, #tpu.memory_space<vmem>>, %arg5: memref<8x8xbf16, #tpu.memory_space<vmem>>, %arg6: memref<4x1x128xf32, #tpu.memory_space<vmem>>, %arg7: memref<8x1xf32, #tpu.memory_space<vmem>>, %arg8: memref<2x8x256xf32, #tpu.memory_space<vmem>>) attributes {dimension_semantics = [#tpu.dimension_semantics<parallel>], iteration_bounds = array<i64: 1>, scalar_prefetch = 0 : i64, scratch_operands = 0 : i64, tpu.core_type = #tpu.core_type<tc>, window_params = [{transform_indices = @transform_0, window_bounds = array<i64: 2, 8, 256>}, {pipeline_mode = #tpu.pipeline_mode<synchronous>, transform_indices = @transform_1, window_bounds = array<i64: 256, 128>}, {pipeline_mode = #tpu.pipeline_mode<synchronous>, transform_indices = @transform_2, window_bounds = array<i64: 128, 256>}, {pipeline_mode = #tpu.pipeline_mode<synchronous>, transform_indices = @transform_3, window_bounds = array<i64: 32, 8>}, {pipeline_mode = #tpu.pipeline_mode<synchronous>, transform_indices = @transform_4, window_bounds = array<i64: 8, 8>}, {pipeline_mode = #tpu.pipeline_mode<synchronous>, transform_indices = @transform_5, window_bounds = array<i64: 4, 1, 128>}, {pipeline_mode = #tpu.pipeline_mode<synchronous>, transform_indices = @transform_6, window_bounds = array<i64: 8, 1>}, {transform_indices = @transform_7, window_bounds = array<i64: 2, 8, 256>}]} {
    %c0 = arith.constant 0 : index
    %c0_0 = arith.constant 0 : index
    %c0_1 = arith.constant 0 : index
    %0 = vector.load %arg1[%c0, %c0_0, %c0_1] : memref<2x8x256xf32, #tpu.memory_space<vmem>>, vector<2x8x256xf32>
    %1 = vector.shape_cast %0 : vector<2x8x256xf32> to vector<16x256xf32>
    %2 = arith.truncf %1 : vector<16x256xf32> to vector<16x256xbf16>
    %c0_2 = arith.constant 0 : index
    %c0_3 = arith.constant 0 : index
    %3 = vector.load %arg2[%c0_2, %c0_3] : memref<256x128xbf16, #tpu.memory_space<vmem>>, vector<256x128xbf16>
    %cst = arith.constant dense<0.000000e+00> : vector<16x128xf32>
    %4 = tpu.matmul %2, %3, %cst {dimension_numbers = #tpu.dot_dimension_numbers<[1], [0], [0], [1], [0, 0, 1, 1], [], []>} : vector<16x256xbf16>, vector<256x128xbf16>, vector<16x128xf32> -> vector<16x128xf32>
    %5 = vector.shape_cast %4 : vector<16x128xf32> to vector<2x8x128xf32>
    %6 = arith.truncf %5 : vector<2x8x128xf32> to vector<2x8x128xbf16>
    %c0_4 = arith.constant 0 : index
    %c0_5 = arith.constant 0 : index
    %7 = vector.load %arg4[%c0_4, %c0_5] : memref<32x8xbf16, #tpu.memory_space<vmem>>, vector<32x8xbf16>
    %8 = vector.shape_cast %7 : vector<32x8xbf16> to vector<1x32x8xbf16>
    %9 = vector.broadcast %8 : vector<1x32x8xbf16> to vector<2x32x8xbf16>
    "tpu.trace_start"() <{level = 10 : i32, message = "bmc,bcp->bmp"}> : () -> ()
    %cst_6 = arith.constant dense<0.000000e+00> : vector<2x32x128xf32>
    %10 = tpu.matmul %9, %6, %cst_6 {dimension_numbers = #tpu.dot_dimension_numbers<[2], [1], [1], [2], [0, 0, 0, 1, 1, 2], [0], [0]>} : vector<2x32x8xbf16>, vector<2x8x128xbf16>, vector<2x32x128xf32> -> vector<2x32x128xf32>
    "tpu.trace_stop"() : () -> ()
    %11 = vector.shape_cast %10 : vector<2x32x128xf32> to vector<2x4x8x128xf32>
    %c0_7 = arith.constant 0 : index
    %c0_8 = arith.constant 0 : index
    %c0_9 = arith.constant 0 : index
    %12 = vector.load %arg6[%c0_7, %c0_8, %c0_9] : memref<4x1x128xf32, #tpu.memory_space<vmem>>, vector<4x1x128xf32>
    %13 = vector.shape_cast %12 : vector<4x1x128xf32> to vector<1x4x1x128xf32>
    %14 = vector.broadcast %13 : vector<1x4x1x128xf32> to vector<2x4x8x128xf32>
    %15 = arith.mulf %11, %14 : vector<2x4x8x128xf32>
    %cst_10 = arith.constant dense<0.000000e+00> : vector<2x8x128xf32>
    %16 = vector.multi_reduction <add>, %15, %cst_10 [1] : vector<2x4x8x128xf32> to vector<2x8x128xf32>
    %17 = vector.shape_cast %16 : vector<2x8x128xf32> to vector<16x128xf32>
    %18 = arith.truncf %17 : vector<16x128xf32> to vector<16x128xbf16>
    %c0_11 = arith.constant 0 : index
    %c0_12 = arith.constant 0 : index
    %19 = vector.load %arg3[%c0_11, %c0_12] : memref<128x256xbf16, #tpu.memory_space<vmem>>, vector<128x256xbf16>
    %cst_13 = arith.constant dense<0.000000e+00> : vector<16x256xf32>
    %20 = tpu.matmul %18, %19, %cst_13 {dimension_numbers = #tpu.dot_dimension_numbers<[1], [0], [0], [1], [0, 0, 1, 1], [], []>} : vector<16x128xbf16>, vector<128x256xbf16>, vector<16x256xf32> -> vector<16x256xf32>
    %c0_14 = arith.constant 0 : index
    %c0_15 = arith.constant 0 : index
    %21 = vector.load %arg5[%c0_14, %c0_15] : memref<8x8xbf16, #tpu.memory_space<vmem>>, vector<8x8xbf16>
    %22 = vector.shape_cast %21 : vector<8x8xbf16> to vector<1x8x8xbf16>
    %23 = vector.broadcast %22 : vector<1x8x8xbf16> to vector<2x8x8xbf16>
    %24 = arith.truncf %0 : vector<2x8x256xf32> to vector<2x8x256xbf16>
    "tpu.trace_start"() <{level = 10 : i32, message = "boc,bcs->bos"}> : () -> ()
    %cst_16 = arith.constant dense<0.000000e+00> : vector<2x8x256xf32>
    %25 = tpu.matmul %23, %24, %cst_16 {dimension_numbers = #tpu.dot_dimension_numbers<[2], [1], [1], [2], [0, 0, 0, 1, 1, 2], [0], [0]>} : vector<2x8x8xbf16>, vector<2x8x256xbf16>, vector<2x8x256xf32> -> vector<2x8x256xf32>
    "tpu.trace_stop"() : () -> ()
    %26 = vector.shape_cast %20 : vector<16x256xf32> to vector<2x8x256xf32>
    %27 = arith.addf %25, %26 : vector<2x8x256xf32>
    %c0_17 = arith.constant 0 : index
    %c0_18 = arith.constant 0 : index
    %28 = vector.load %arg7[%c0_17, %c0_18] : memref<8x1xf32, #tpu.memory_space<vmem>>, vector<8x1xf32>
    %29 = vector.shape_cast %28 : vector<8x1xf32> to vector<1x8x1xf32>
    %30 = vector.broadcast %29 : vector<1x8x1xf32> to vector<2x8x256xf32>
    %31 = arith.addf %27, %30 : vector<2x8x256xf32>
    %cst_19 = arith.constant 0.000000e+00 : f32
    %32 = vector.broadcast %cst_19 : f32 to vector<2x8x256xf32>
    %33 = arith.maximumf %31, %32 : vector<2x8x256xf32>
    %c0_20 = arith.constant 0 : index
    %c0_21 = arith.constant 0 : index
    %c0_22 = arith.constant 0 : index
    %34 = vector.load %arg8[%c0_20, %c0_21, %c0_22] : memref<2x8x256xf32, #tpu.memory_space<vmem>>, vector<2x8x256xf32>
    tpu.vector_store %arg8[%c0_20, %c0_21, %c0_22], %33 {strides = array<i32>} : memref<2x8x256xf32, #tpu.memory_space<vmem>>, vector<2x8x256xf32>,
    return
  }
  func.func @transform_0(%arg0: i32) -> (i32, i32, i32) {
    %c0_i32 = arith.constant 0 : i32
    %c0_i32_0 = arith.constant 0 : i32
    %c0_i32_1 = arith.constant 0 : i32
    return %arg0, %c0_i32, %c0_i32_0 : i32, i32, i32
  }
  func.func @transform_1(%arg0: i32) -> (i32, i32) {
    %c0_i32 = arith.constant 0 : i32
    %c0_i32_0 = arith.constant 0 : i32
    %c0_i32_1 = arith.constant 0 : i32
    return %c0_i32, %c0_i32_0 : i32, i32
  }
  func.func @transform_2(%arg0: i32) -> (i32, i32) {
    %c0_i32 = arith.constant 0 : i32
    %c0_i32_0 = arith.constant 0 : i32
    %c0_i32_1 = arith.constant 0 : i32
    return %c0_i32, %c0_i32_0 : i32, i32
  }
  func.func @transform_3(%arg0: i32) -> (i32, i32) {
    %c0_i32 = arith.constant 0 : i32
    %c0_i32_0 = arith.constant 0 : i32
    %c0_i32_1 = arith.constant 0 : i32
    return %c0_i32, %c0_i32_0 : i32, i32
  }
  func.func @transform_4(%arg0: i32) -> (i32, i32) {
    %c0_i32 = arith.constant 0 : i32
    %c0_i32_0 = arith.constant 0 : i32
    %c0_i32_1 = arith.constant 0 : i32
    return %c0_i32, %c0_i32_0 : i32, i32
  }
  func.func @transform_5(%arg0: i32) -> (i32, i32, i32) {
    %c0_i32 = arith.constant 0 : i32
    %c0_i32_0 = arith.constant 0 : i32
    %c0_i32_1 = arith.constant 0 : i32
    %c0_i32_2 = arith.constant 0 : i32
    return %c0_i32, %c0_i32_0, %c0_i32_1 : i32, i32, i32
  }
  func.func @transform_6(%arg0: i32) -> (i32, i32) {
    %c0_i32 = arith.constant 0 : i32
    %c0_i32_0 = arith.constant 0 : i32
    %c0_i32_1 = arith.constant 0 : i32
    return %c0_i32, %c0_i32_0 : i32, i32
  }
  func.func @transform_7(%arg0: i32) -> (i32, i32, i32) {
    %c0_i32 = arith.constant 0 : i32
    %c0_i32_0 = arith.constant 0 : i32
    %c0_i32_1 = arith.constant 0 : i32
    return %arg0, %c0_i32, %c0_i32_0 : i32, i32, i32
  }
}

</mosaic_0001>

<bundles_post_ra>
// kernel: tpu_custom_call.1
= control target key start
LH: loop header
LB: loop body
LE: loop exit
PB: predicated region body
PF: predicated region fallthrough
CT: control target
= control target key end

     0   :  { %12 = vsyncpa [#allocation3], 0  ;;  %s989_s0 = inlined_call_operand.hbm [shape: f32[2,8,256], index: 0, kind: input, shape index: {}]   ;;  %s990_s1 = inlined_call_operand.hbm [shape: bf16[256,128], index: 1, kind: input, shape index: {}]   ;;  %s991_s2 = inlined_call_operand.hbm [shape: bf16[128,256], index: 2, kind: input, shape index: {}]   ;;  %s992_s3 = inlined_call_operand.vmem [shape: bf16[32,8], index: 3, kind: input, shape index: {}]   ;;  %s993_s4 = inlined_call_operand.vmem [shape: bf16[8,8], index: 4, kind: input, shape index: {}]   ;;  %s994_s5 = inlined_call_operand.vmem [shape: f32[4,1,128], index: 5, kind: input, shape index: {}]   ;;  %s995_s6 = inlined_call_operand.vmem [shape: f32[8,1], index: 6, kind: input, shape index: {}]   ;;  %s996_s7 = inlined_call_operand.hbm [shape: f32[2,8,256], index: 7, kind: output, shape index: {}]  }
   0x1   :  { %13 = vsyncpa [#allocation6], 0  ;;  %s32_s26 = sshll.u32 %s990_s1, 4  ;;  %s33_s26 = int_to_ptr.hbm [resolvable:$true] %s32_s26 }
   0x2   :  { %14 = vsyncpa [#allocation4], 0  ;;  %s874_s27 = smov [#allocation5]   ;;  %s19_s8 = sshll.u32 %s989_s0, 4  ;;  %s20_s8 = int_to_ptr.hbm [resolvable:$true] %s19_s8 }
   0x3   :  { %s34_s28 = sshll.u32 %s874_s27, 4  ;;  %s875_s9 = smov 64   ;;  %s35_s28 = int_to_ptr.vmem [resolvable:$true] %s34_s28 }
   0x4   :  { %s876_s10 = smov 4   ;;  %s877_s11 = smov [#allocation2]  }
   0x5   :  { %40 = dma.hbm_to_vmem [thread:$0]  %s33_s26, 2048, %s35_s28, [#allocation6], %s875_s9, %s875_s9, %s876_s10  }
   0x6   :  { %s21_s12 = sshll.u32 %s877_s11, 4  ;;  %s878_s13 = smov 256   ;;  %s22_s12 = int_to_ptr.vmem [resolvable:$true] %s21_s12 }
   0x7   :  { %s879_s14 = smov 16   ;;  %s45_s16 = sshll.u32 %s991_s2, 4  ;;  %s46_s16 = int_to_ptr.hbm [resolvable:$true] %s45_s16 }
   0x8   :  { %27 = dma.hbm_to_vmem [thread:$0]  %s20_s8, 512, %s22_s12, [#allocation3], %s878_s13, %s878_s13, %s879_s14  }
   0x9   :  { %s880_s17 = smov [#allocation7]   ;;  %s881_s18 = smov 128  }
   0xa   :  { %s47_s0 = sshll.u32 %s880_s17, 4  ;;  %s882_s19 = smov 8   ;;  %s48_s0 = int_to_ptr.vmem [resolvable:$true] %s47_s0 }
   0xb   :  { %53 = dma.hbm_to_vmem [thread:$0]  %s46_s16, 2048, %s48_s0, [#allocation6], %s881_s18, %s881_s18, %s882_s19  }
   0xc   :  { %868 = dma.done.wait [#allocation3], 512  }
   0xd   :  { %869 = vsyncadd [#allocation3], 4294966784 }
   0xe   :  { %870 = dma.done.wait [#allocation6], 4096  }
   0xf   :  { %871 = vsyncadd [#allocation6], 4294963200  ;;  %v729_v0 = vld [vmem:[#allocation5 + $0x38] sm:$0xff]  ;;  %v728_v2 = vld [vmem:[#allocation5 + $0x30] sm:$0xff]  ;;  %vm260_vm0 = vcmask 1043456   ;;  %vm253_vm1 = vcmask 64512  }
  0x10   :  { %v737_v1 = vld [vmem:[#allocation5 + $0x78] sm:$0xff]  ;;  %209 = vmatpush.bf16.msra.mxu0 %v729_v0  ;;  %v736_v3 = vld [vmem:[#allocation5 + $0x70] sm:$0xff]  ;;  %v727_v4 = vld [vmem:[#allocation5 + $0x28] sm:$0xff]  ;;  %s564_s12 = sshll.u32 %s996_s7, 4  ;;  %s565_s12 = int_to_ptr.hbm [resolvable:$true] %s564_s12 }
  0x11   :  { %223 = vmatpush.bf16.msra.mxu1 %v737_v1  ;;  %v735_v5 = vld [vmem:[#allocation5 + $0x68] sm:$0xff]  ;;  %v75_v6 = vld [vmem:[#allocation2] sm:$0xff]  ;;  %v77_v7 = vld [vmem:[#allocation2 + $0x10] sm:$0xff] }
  0x12   :  { %v76_v8 = vld [vmem:[#allocation2 + $0x8] sm:$0xff]  ;;  %v78_v9 = vld [vmem:[#allocation2 + $0x18] sm:$0xff]  ;;  %v726_v12 = vld [vmem:[#allocation5 + $0x20] sm:$0xff]  ;;  %v79_v22 = vpack.c.bf16 %v77_v7, %v75_v6 }
  0x13   :  { %v937_v10 = vpack.c.bf16 %v76_v8, %v75_v6  ;;  %v939_v11 = vpack.c.bf16 %v78_v9, %v77_v7  ;;  %v734_v13 = vld [vmem:[#allocation5 + $0x60] sm:$0xff]  ;;  %v725_v14 = vld [vmem:[#allocation5 + $0x18] sm:$0xff]  ;;  %v724_v16 = vld [vmem:[#allocation5 + $0x10] sm:$0xff]  ;;  %v80_v23 = vpack.c.bf16 %v78_v9, %v76_v8 }
  0x14   :  { %210 = vmatpush.bf16.msra.mxu0 %v728_v2  ;;  %v733_v15 = vld [vmem:[#allocation5 + $0x58] sm:$0xff]  ;;  %v732_v17 = vld [vmem:[#allocation5 + $0x50] sm:$0xff]  ;;  %v723_v18 = vld [vmem:[#allocation5 + $0x8] sm:$0xff] }
  0x15   :  { %224 = vmatpush.bf16.msra.mxu1 %v736_v3  ;;  %v731_v19 = vld [vmem:[#allocation5 + $0x48] sm:$0xff]  ;;  %v722_v20 = vld [vmem:[#allocation5] sm:$0xff]  ;;  %v712_v36 = vld [vmem:[#allocation7 + $0x70] sm:$0xf] }
  0x16   :  { %v730_v21 = vld [vmem:[#allocation5 + $0x40] sm:$0xff]  ;;  %v739_v35 = vld [vmem:[%s992_s3 + $0x8] sm:$0xff]  ;;  %v755_v37 = vld [vmem:[#allocation7 + $0x74] sm:$0xf0] }
  0x17   :  { %v738_v29 = vld [vmem:[%s992_s3] sm:$0xff]  ;;  %v754_v38 = vld [vmem:[#allocation7 + $0x74] sm:$0xf]  ;;  %v713_v39 = vor.u32 %v755_v37, %v712_v36  ;;  %v714_v40 = vld [vmem:[#allocation7 + $0x78] sm:$0xf0] }
  0x18   :  { %211 = vmatpush.bf16.msra.mxu0 %v727_v4  ;;  %v717_v41 = vor.u32 %v754_v38, %v714_v40  ;;  %v704_v42 = vld [vmem:[#allocation7 + $0x60] sm:$0xf]  ;;  %v753_v43 = vld [vmem:[#allocation7 + $0x64] sm:$0xf0]  ;;  %v752_v44 = vld [vmem:[#allocation7 + $0x64] sm:$0xf] }
  0x19   :  { %225 = vmatpush.bf16.msra.mxu1 %v735_v5  ;;  %v705_v45 = vor.u32 %v753_v43, %v704_v42  ;;  %v706_v46 = vld [vmem:[#allocation7 + $0x68] sm:$0xf0]  ;;  %v696_v48 = vld [vmem:[#allocation7 + $0x50] sm:$0xf]  ;;  %v751_v49 = vld [vmem:[#allocation7 + $0x54] sm:$0xf0] }
  0x1a   :  { %v709_v47 = vor.u32 %v752_v44, %v706_v46  ;;  %v750_v50 = vld [vmem:[#allocation7 + $0x54] sm:$0xf]  ;;  %v697_v51 = vor.u32 %v751_v49, %v696_v48  ;;  %v698_v52 = vld [vmem:[#allocation7 + $0x58] sm:$0xf0]  ;;  %v688_v54 = vld [vmem:[#allocation7 + $0x40] sm:$0xf] }
  0x1b   :  { %v701_v53 = vor.u32 %v750_v50, %v698_v52  ;;  %v749_v55 = vld [vmem:[#allocation7 + $0x44] sm:$0xf0]  ;;  %v748_v56 = vld [vmem:[#allocation7 + $0x44] sm:$0xf]  ;;  %v690_v58 = vld [vmem:[#allocation7 + $0x48] sm:$0xf0] }
  0x1c   :  { %212 = vmatpush.bf16.msra.mxu0 %v726_v12  ;;  %v689_v57 = vor.u32 %v749_v55, %v688_v54  ;;  %v693_v59 = vor.u32 %v748_v56, %v690_v58  ;;  %v680_v60 = vld [vmem:[#allocation7 + $0x30] sm:$0xf]  ;;  %v747_v61 = vld [vmem:[#allocation7 + $0x34] sm:$0xf0]  ;;  %v746_v62 = vld [vmem:[#allocation7 + $0x34] sm:$0xf] }
  0x1d   :  { %226 = vmatpush.bf16.msra.mxu1 %v734_v13  ;;  %v681_v63 = vor.u32 %v747_v61, %v680_v60  ;;  %v682_v0 = vld [vmem:[#allocation7 + $0x38] sm:$0xf0]  ;;  %v672_v2 = vld [vmem:[#allocation7 + $0x20] sm:$0xf]  ;;  %v745_v3 = vld [vmem:[#allocation7 + $0x24] sm:$0xf0] }
  0x1e   :  { %v685_v1 = vor.u32 %v746_v62, %v682_v0  ;;  %v744_v4 = vld [vmem:[#allocation7 + $0x24] sm:$0xf]  ;;  %v673_v5 = vor.u32 %v745_v3, %v672_v2  ;;  %v674_v6 = vld [vmem:[#allocation7 + $0x28] sm:$0xf0]  ;;  %v664_v8 = vld [vmem:[#allocation7 + $0x10] sm:$0xf] }
  0x1f   :  { %v677_v7 = vor.u32 %v744_v4, %v674_v6  ;;  %v743_v9 = vld [vmem:[#allocation7 + $0x14] sm:$0xf0]  ;;  %v742_v12 = vld [vmem:[#allocation7 + $0x14] sm:$0xf]  ;;  %v768_v38 = vld [vmem:[%s994_s5] ss:$0 sm:$0xff] }
  0x20   :  { %213 = vmatpush.bf16.msra.mxu0 %v725_v14  ;;  %v665_v13 = vor.u32 %v743_v9, %v664_v8  ;;  %v666_v14 = vld [vmem:[#allocation7 + $0x18] sm:$0xf0]  ;;  %v540_v40 = vld [vmem:[%s995_s6] sm:$0xff]  ;;  %v883_v42 = vmov 0  }
  0x21   :  { %227 = vmatpush.bf16.msra.mxu1 %v733_v15  ;;  %v669_v15 = vor.u32 %v742_v12, %v666_v14  ;;  %767 = vset.pattern.permute.xlu0 %v883_v42  ;;  %v770_v43 = vld [vmem:[%s994_s5 + $0x2] ss:$0 sm:$0xff] }
  0x22   :  { %543 = vperm.xlu0 %767, %v540_v40  }
  0x24   :  { %214 = vmatpush.bf16.msra.mxu0 %v724_v16 }
  0x25   :  { %228 = vmatpush.bf16.msra.mxu1 %v732_v17  ;;  %v656_v17 = vld [vmem:[#allocation7] sm:$0xf] }
  0x28   :  { %215 = vmatpush.bf16.msra.mxu0 %v723_v18  ;;  %v741_v18 = vld [vmem:[#allocation7 + $0x4] sm:$0xf0] }
  0x29   :  { %229 = vmatpush.bf16.msra.mxu1 %v731_v19  ;;  %v740_v19 = vld [vmem:[#allocation7 + $0x4] sm:$0xf] }
  0x2c   :  { %216 = vmatpush.bf16.msra.mxu0 %v722_v20  ;;  %v657_v20 = vor.u32 %v741_v18, %v656_v17 }
  0x2d   :  { %230 = vmatpush.bf16.msra.mxu1 %v730_v21  ;;  %v658_v21 = vld [vmem:[#allocation7 + $0x8] sm:$0xf0] }
  0x2f   :  { %217 = vmatmul.bf16.vlgmr.msra.gmra.mxu0 %v79_v22  ;;  %v504_v22 = vunpack.c.l.b16 %v939_v11 }
  0x30   :  { %231 = vmatmul.bf16.vlgmr.msra.gmra.mxu1 %v80_v23  ;;  %v505_v23 = vunpack.c.h.b16 %v939_v11 }
  0x94   :  { %v544_v2 = vpop.permute.xlu0 %543 }
  0xac   :  { %v218_v24 = vpop.f32.mrf.mxu0 }
  0xad   :  { %v232_v25 = vpop.f32.mrf.mxu1 }
  0xae   :  { %v233_v26 = vadd.f32 %v232_v25, %v218_v24  ;;  %v661_v24 = vor.u32 %v740_v19, %v658_v21  ;;  %v464_v25 = vunpack.c.l.b16 %v937_v10 }
  0xb0   :  { %v237_v27 = vpack.c.bf16 %v233_v26, %v233_v26  ;;  %v465_v26 = vunpack.c.h.b16 %v937_v10  ;;  %v460_v10 = vld [vmem:[%s993_s4] sm:$0xf] }
  0xb2   :  { %v262_v28 = vsel %vm260_vm0, %v237_v27, 0  ;;  %v506_v27 = vpack.c.b16 %v504_v22, %v504_v22 }
  0xb3   :  { %271 = vmatpush.bf16.msra.mxu2 %v262_v28  ;;  %v507_v28 = vpack.c.b16 %v505_v23, %v505_v23 }
  0xb4   :  { %v220_v30 = vpop.f32.mrf.mxu0 }
  0xb5   :  { %v234_v31 = vpop.f32.mrf.mxu1 }
  0xb6   :  { %v235_v32 = vadd.f32 %v234_v31, %v220_v30  ;;  %650 = vmatmul.msk.bf16.vlgmr.msra.gmra.mxu2 %vm253_vm1, %v738_v29  ;;  %v467_v30 = vpack.c.b16 %v465_v26, %v465_v26 }
  0xb7   :  { %432 = vmatpush.bf16.msrb.mxu2 %v713_v39  ;;  %v769_v39 = vld [vmem:[%s994_s5 + $0x1] ss:$0 sm:$0xff] }
  0xb8   :  { %v238_v33 = vpack.c.bf16 %v235_v32, %v235_v32 }
  0xba   :  { %v284_v34 = vsel %vm260_vm0, %v238_v33, 0  ;;  %v509_v33 = vsel %vm260_vm0, %v506_v27, 0 }
  0xbb   :  { %293 = vmatpush.bf16.msra.mxu3 %v284_v34  ;;  %433 = vmatpush.bf16.msrb.mxu2 %v705_v45  ;;  %v512_v34 = vsel %vm260_vm0, %v507_v28, 0 }
  0xbe   :  { %652 = vmatmul.msk.bf16.vlgmr.msra.gmra.mxu3 %vm253_vm1, %v738_v29  ;;  %v466_v29 = vpack.c.b16 %v464_v25, %v464_v25 }
  0xbf   :  { %446 = vmatpush.bf16.msrb.mxu3 %v717_v41  ;;  %434 = vmatpush.bf16.msrb.mxu2 %v697_v51 }
  0xc0   :  { %v472_v11 = vsel %vm260_vm0, %v466_v29, 0 }
  0xc1   :  { %484 = vmatpush.bf16.msrb.mxu0 %v472_v11 }
  0xc3   :  { %447 = vmatpush.bf16.msrb.mxu3 %v709_v47  ;;  %435 = vmatpush.bf16.msrb.mxu2 %v689_v57  ;;  %v771_v47 = vld [vmem:[%s994_s5 + $0x3] ss:$0 sm:$0xff]  ;;  %s884_s5 = smov [#allocation8]  }
  0xc4   :  { %718 = vmatmul.msk.bf16.vlgmr.msrb.gmra.mxu0 %vm253_vm1, %v460_v10  ;;  %s562_s6 = sshll.u32 %s884_s5, 4  ;;  %s563_s6 = int_to_ptr.vmem [resolvable:$true] %s562_s6 }
  0xc6   :  { %651 = vmatmul.msk.bf16.gmra.mxu2 %vm253_vm1, %v739_v35 }
  0xc7   :  { %448 = vmatpush.bf16.msrb.mxu3 %v701_v53  ;;  %436 = vmatpush.bf16.msrb.mxu2 %v681_v63 }
  0xcb   :  { %449 = vmatpush.bf16.msrb.mxu3 %v693_v59  ;;  %437 = vmatpush.bf16.msrb.mxu2 %v673_v5 }
  0xce   :  { %653 = vmatmul.msk.bf16.gmra.mxu3 %vm253_vm1, %v739_v35  ;;  %v475_v35 = vsel %vm260_vm0, %v467_v30, 0 }
  0xcf   :  { %450 = vmatpush.bf16.msrb.mxu3 %v685_v1  ;;  %438 = vmatpush.bf16.msrb.mxu2 %v665_v13 }
  0xd0   :  { %497 = vmatpush.bf16.msrb.mxu1 %v475_v35 }
  0xd3   :  { %451 = vmatpush.bf16.msrb.mxu3 %v677_v7  ;;  %439 = vmatpush.bf16.msrb.mxu2 %v657_v20 }
  0xd4   :  { %719 = vmatmul.msk.bf16.vlgmr.msrb.gmra.mxu1 %vm253_vm1, %v460_v10 }
  0xd7   :  { %452 = vmatpush.bf16.msrb.mxu3 %v669_v15  ;;  %521 = vmatpush.bf16.msra.mxu2 %v509_v33 }
  0xdb   :  { %453 = vmatpush.bf16.msrb.mxu3 %v661_v24 }
  0xdf   :  { %534 = vmatpush.bf16.msra.mxu3 %v512_v34 }
 0x139   :  { %v273_v16 = vpop.f32.mrf.mxu2 }
 0x13a   :  { %v321_v44 = vmul.f32 %v768_v38, %v273_v16 }
 0x141   :  { %v275_v31 = vpop.f32.mrf.mxu2  ;;  %v295_v32 = vpop.f32.mrf.mxu3 }
 0x142   :  { %v322_v45 = vmul.f32 %v769_v39, %v275_v31  ;;  %v325_v49 = vmul.f32 %v768_v38, %v295_v32  ;;  %v486_v62 = vpop.f32.mrf.mxu0 }
 0x144   :  { %v329_v52 = vadd.f32 %v322_v45, %v321_v44 }
 0x149   :  { %v297_v36 = vpop.f32.mrf.mxu3  ;;  %v278_v37 = vpop.f32.mrf.mxu2 }
 0x14a   :  { %v326_v46 = vmul.f32 %v769_v39, %v297_v36  ;;  %v323_v50 = vmul.f32 %v770_v43, %v278_v37  ;;  %v488_v0 = vpop.f32.mrf.mxu0 }
 0x14c   :  { %v332_v53 = vadd.f32 %v326_v46, %v325_v49  ;;  %v330_v56 = vadd.f32 %v329_v52, %v323_v50 }
 0x151   :  { %v300_v41 = vpop.f32.mrf.mxu3  ;;  %v280_v48 = vpop.f32.mrf.mxu2 }
 0x152   :  { %v327_v51 = vmul.f32 %v770_v43, %v300_v41  ;;  %v324_v54 = vmul.f32 %v771_v47, %v280_v48  ;;  %v499_v63 = vpop.f32.mrf.mxu1 }
 0x154   :  { %v333_v57 = vadd.f32 %v332_v53, %v327_v51  ;;  %v331_v59 = vadd.f32 %v330_v56, %v324_v54 }
 0x159   :  { %v302_v55 = vpop.f32.mrf.mxu3 }
 0x15a   :  { %v328_v58 = vmul.f32 %v771_v47, %v302_v55  ;;  %v501_v1 = vpop.f32.mrf.mxu1 }
 0x15c   :  { %v334_v60 = vadd.f32 %v333_v57, %v328_v58 }
 0x15e   :  { %v335_v61 = vpack.c.bf16 %v334_v60, %v331_v59 }
 0x160   :  { %440 = vmatmul.bf16.vlgmr.msrb.gmra.mxu2 %v335_v61  ;;  %454 = vmatmul.bf16.vlgmr.msrb.gmra.mxu3 %v335_v61 }
 0x170   :  { %720 = vmatmul.msk.bf16.vlgmr.msra.gmra.mxu2 %vm253_vm1, %v460_v10  ;;  %721 = vmatmul.msk.bf16.vlgmr.msra.gmra.mxu3 %vm253_vm1, %v460_v10 }
 0x1e3   :  { %v441_v3 = vpop.f32.mrf.mxu2  ;;  %v455_v4 = vpop.f32.mrf.mxu3 }
 0x1e4   :  { %v487_v5 = vadd.f32 %v486_v62, %v441_v3  ;;  %v500_v6 = vadd.f32 %v499_v63, %v455_v4 }
 0x1e6   :  { %v546_v7 = vadd.f32 %v544_v2, %v487_v5  ;;  %v547_v8 = vadd.f32 %v544_v2, %v500_v6 }
 0x1e8   :  { %v550_v9 = vmax.f32 %v546_v7, 0.0  ;;  %v551_v12 = vmax.f32 %v547_v8, 0.0 }
 0x1ea   :  { %554 = vst [vmem:[#allocation8] sm:$0xff] %v550_v9 }
 0x1eb   :  { %555 = vst [vmem:[#allocation8 + $0x8] sm:$0xff] %v551_v12  ;;  %v443_v13 = vpop.f32.mrf.mxu2  ;;  %v457_v14 = vpop.f32.mrf.mxu3 }
 0x1f3   :  { %v523_v15 = vpop.f32.mrf.mxu2  ;;  %v536_v16 = vpop.f32.mrf.mxu3 }
 0x1f4   :  { %v524_v17 = vadd.f32 %v523_v15, %v443_v13  ;;  %v537_v18 = vadd.f32 %v536_v16, %v457_v14 }
 0x1f6   :  { %v548_v19 = vadd.f32 %v544_v2, %v524_v17  ;;  %v549_v20 = vadd.f32 %v544_v2, %v537_v18 }
 0x1f8   :  { %v552_v21 = vmax.f32 %v548_v19, 0.0  ;;  %v553_v22 = vmax.f32 %v549_v20, 0.0 }
 0x1fa   :  { %556 = vst [vmem:[#allocation8 + $0x10] sm:$0xff] %v552_v21 }
 0x1fb   :  { %557 = vst [vmem:[#allocation8 + $0x18] sm:$0xff] %v553_v22  ;;  %v525_v23 = vpop.f32.mrf.mxu2  ;;  %v538_v24 = vpop.f32.mrf.mxu3 }
 0x1fc   :  { %570 = dma.vmem_to_hbm [thread:$0]  %s563_s6, 512, %s565_s12, [#allocation4], %s878_s13, %s878_s13, %s879_s14  }
 0x1fd   :  { %872 = dma.done.wait [#allocation4], 512  }
 0x1fe   :  { %873 = vsyncadd [#allocation4], 4294966784 }
 0x1ff   :  { %575 = vsyncpa [#allocation3], 1 }
 0x200   :  { %576 = vsyncpa [#allocation6], 1 }
 0x201   :  { %577 = vsyncpa [#allocation4], 1 }

</bundles_post_ra>
